<compile_context>
chip_gen: v7x
topology: tpu7x:2x2x1
jax: 0.10.0
libtpu: 0.0.40
codegen_flags: <defaults>
</compile_context>

<pallas_src>
import jax
import jax.numpy as jnp
from jax import lax
from jax.experimental import pallas as pl
from jax.experimental.pallas import tpu as pltpu

KSIZE = 3
PAD = 1


def _convt_kernel(x_ref, w_ref, b_ref, o_ref):
    """Fused ConvTranspose2d(C->1, 3x3, pad=1) + transpose(3,1) for one batch element.

    x_ref: (C, W+2, H+2) VMEM  -- zero-padded, spatially transposed input slab.
    w_ref: (3*3*C,)      SMEM  -- flat taps, layout [(kx*3 + ky)*C + ci].
    b_ref: (1,)          SMEM  -- bias.
    o_ref: (W, H)        VMEM  -- final (already transposed) output plane.
    """
    C = x_ref.shape[0]
    Wd, Hd = o_ref.shape
    acc = jnp.zeros((Wd, Hd), jnp.float32)
    # Static 3x3xC shift-MAC: SMEM scalar tap broadcast-multiplied into the (W, H) tile on the VPU.
    for kx in range(KSIZE):
        for ky in range(KSIZE):
            for ci in range(C):
                tap = w_ref[(kx * KSIZE + ky) * C + ci]
                acc = acc + x_ref[ci, kx:kx + Wd, ky:ky + Hd] * tap
    o_ref[...] = acc + b_ref[0]


def output_projection_forward(images, params):
    """images: (N, C, H, W) f32; params: weight (C, 1, 3, 3), bias (1,).

    Returns (N, W, H, 1) f32, equal to
        y = ConvTranspose2d(C, 1, (3, 3), padding=1)(images); return torch.transpose(y, 3, 1)
    """
    N, C, H, W = images.shape
    w = params["weight"].astype(jnp.float32)            # (C, 1, 3, 3)  (PyTorch ConvTranspose2d layout)
    b = params["bias"].astype(jnp.float32)              # (1,)

    # ConvTranspose2d(stride=1, pad=1) == regular conv (pad=1) with the spatially flipped kernel:
    #   y[n,0,h,w] = b + sum_{ci,ky,kx} xpad[n,ci,h+ky,w+kx] * Wf[ci,ky,kx],  Wf[ci,ky,kx] = w[ci,0,2-ky,2-kx]
    # Final output out[n,w,h,0] = y[n,0,h,w] = b + sum_{ci,kx,ky} xpad_t[n,ci,w+kx,h+ky] * Wf[ci,ky,kx],
    # so feed the spatially transposed padded input and taps[kx,ky,ci] = Wf[ci,ky,kx].
    xpad = jnp.pad(images.astype(jnp.float32), ((0, 0), (0, 0), (PAD, PAD), (PAD, PAD)))
    xpad_t = jnp.transpose(xpad, (0, 1, 3, 2))           # (N, C, W+2, H+2)  -- layout plumbing (glue)

    w_flip = jnp.flip(w[:, 0, :, :], axis=(1, 2))        # (C, 3, 3) = Wf[ci, ky, kx]
    taps = jnp.transpose(w_flip, (2, 1, 0)).reshape(-1)  # flat (3*3*C,), index [(kx*3+ky)*C + ci]

    out = pl.pallas_call(
        _convt_kernel,
        grid=(N,),
        out_shape=jax.ShapeDtypeStruct((N, W, H), jnp.float32),
        in_specs=[
            pl.BlockSpec((None, C, W + 2 * PAD, H + 2 * PAD), lambda n: (n, 0, 0, 0)),
            pl.BlockSpec(memory_space=pltpu.MemorySpace.SMEM),
            pl.BlockSpec(memory_space=pltpu.MemorySpace.SMEM),
        ],
        out_specs=pl.BlockSpec((None, W, H), lambda n: (n, 0, 0)),
        compiler_params=pltpu.CompilerParams(dimension_semantics=("parallel",)),
    )(xpad_t, taps, b)

    return out[..., None]                                # (N, W, H, 1)


# ---------------- pure-JAX reference (correctness check only) ----------------

def reference_forward(images, params):
    w = params["weight"]                                                     # (C, 1, 3, 3)
    w_conv = jnp.transpose(jnp.flip(w, axis=(2, 3)), (1, 0, 2, 3))           # OIHW (1, C, 3, 3)
    y = lax.conv_general_dilated(
        images, w_conv, window_strides=(1, 1), padding=((PAD, PAD), (PAD, PAD)),
        dimension_numbers=("NCHW", "OIHW", "NCHW"),
        precision=lax.Precision.HIGHEST)
    y = y + params["bias"][None, :, None, None]
    return jnp.transpose(y, (0, 3, 2, 1))                                    # torch.transpose(y, 3, 1)


if __name__ == "__main__":
    N, C, H, W = 2, 4, 16, 16
    key = jax.random.PRNGKey(0)
    k1, k2, k3 = jax.random.split(key, 3)
    params = {
        "weight": 0.2 * jax.random.normal(k1, (C, 1, KSIZE, KSIZE), jnp.float32),
        "bias": 0.1 * jax.random.normal(k2, (1,), jnp.float32),
    }
    images = jax.random.normal(k3, (N, C, H, W), jnp.float32)

    out = jax.block_until_ready(output_projection_forward(images, params))
    ref = jax.block_until_ready(reference_forward(images, params))

    assert out.shape == (N, W, H, 1) and out.dtype == jnp.float32
    assert float(jnp.max(jnp.abs(out - ref))) < 1e-4, "Pallas output mismatch vs reference"
    print("KERNEL_OK")
</pallas_src>

<mosaic_0001>
module attributes {stable_mosaic.version = 11 : i64} {
  func.func @_convt_kernel(%arg0: i32, %arg1: memref<1x4x18x18xf32, #tpu.memory_space<vmem>>, %arg2: memref<36xf32, #tpu.memory_space<smem>>, %arg3: memref<1xf32, #tpu.memory_space<smem>>, %arg4: memref<1x16x16xf32, #tpu.memory_space<vmem>>) attributes {dimension_semantics = [#tpu.dimension_semantics<parallel>], iteration_bounds = array<i64: 2>, scalar_prefetch = 0 : i64, scratch_operands = 0 : i64, tpu.core_type = #tpu.core_type<tc>, window_params = [{transform_indices = @transform_0, window_bounds = array<i64: 1, 4, 18, 18>}, {transform_indices = @transform_1, window_bounds = array<i64: 36>}, {transform_indices = @transform_2, window_bounds = array<i64: 1>}, {transform_indices = @transform_3, window_bounds = array<i64: 1, 16, 16>}]} {
    %cst = arith.constant 0.000000e+00 : f32
    %0 = vector.broadcast %cst : f32 to vector<16x16xf32>
    %c0 = arith.constant 0 : index
    %1 = memref.load %arg2[%c0] : memref<36xf32, #tpu.memory_space<smem>>
    %c0_0 = arith.constant 0 : index
    %c0_1 = arith.constant 0 : index
    %c0_2 = arith.constant 0 : index
    %c0_3 = arith.constant 0 : index
    %2 = vector.load %arg1[%c0_0, %c0_1, %c0_2, %c0_3] : memref<1x4x18x18xf32, #tpu.memory_space<vmem>>, vector<1x1x16x16xf32>
    %3 = vector.shape_cast %2 : vector<1x1x16x16xf32> to vector<16x16xf32>
    %4 = vector.broadcast %1 : f32 to vector<16x16xf32>
    %5 = arith.mulf %3, %4 : vector<16x16xf32>
    %6 = arith.addf %0, %5 : vector<16x16xf32>
    %c1 = arith.constant 1 : index
    %7 = memref.load %arg2[%c1] : memref<36xf32, #tpu.memory_space<smem>>
    %c0_4 = arith.constant 0 : index
    %c1_5 = arith.constant 1 : index
    %c0_6 = arith.constant 0 : index
    %c0_7 = arith.constant 0 : index
    %8 = vector.load %arg1[%c0_4, %c1_5, %c0_6, %c0_7] : memref<1x4x18x18xf32, #tpu.memory_space<vmem>>, vector<1x1x16x16xf32>
    %9 = vector.shape_cast %8 : vector<1x1x16x16xf32> to vector<16x16xf32>
    %10 = vector.broadcast %7 : f32 to vector<16x16xf32>
    %11 = arith.mulf %9, %10 : vector<16x16xf32>
    %12 = arith.addf %6, %11 : vector<16x16xf32>
    %c2 = arith.constant 2 : index
    %13 = memref.load %arg2[%c2] : memref<36xf32, #tpu.memory_space<smem>>
    %c0_8 = arith.constant 0 : index
    %c2_9 = arith.constant 2 : index
    %c0_10 = arith.constant 0 : index
    %c0_11 = arith.constant 0 : index
    %14 = vector.load %arg1[%c0_8, %c2_9, %c0_10, %c0_11] : memref<1x4x18x18xf32, #tpu.memory_space<vmem>>, vector<1x1x16x16xf32>
    %15 = vector.shape_cast %14 : vector<1x1x16x16xf32> to vector<16x16xf32>
    %16 = vector.broadcast %13 : f32 to vector<16x16xf32>
    %17 = arith.mulf %15, %16 : vector<16x16xf32>
    %18 = arith.addf %12, %17 : vector<16x16xf32>
    %c3 = arith.constant 3 : index
    %19 = memref.load %arg2[%c3] : memref<36xf32, #tpu.memory_space<smem>>
    %c0_12 = arith.constant 0 : index
    %c3_13 = arith.constant 3 : index
    %c0_14 = arith.constant 0 : index
    %c0_15 = arith.constant 0 : index
    %20 = vector.load %arg1[%c0_12, %c3_13, %c0_14, %c0_15] : memref<1x4x18x18xf32, #tpu.memory_space<vmem>>, vector<1x1x16x16xf32>
    %21 = vector.shape_cast %20 : vector<1x1x16x16xf32> to vector<16x16xf32>
    %22 = vector.broadcast %19 : f32 to vector<16x16xf32>
    %23 = arith.mulf %21, %22 : vector<16x16xf32>
    %24 = arith.addf %18, %23 : vector<16x16xf32>
    %c4 = arith.constant 4 : index
    %25 = memref.load %arg2[%c4] : memref<36xf32, #tpu.memory_space<smem>>
    %c0_16 = arith.constant 0 : index
    %c0_17 = arith.constant 0 : index
    %c0_18 = arith.constant 0 : index
    %c1_19 = arith.constant 1 : index
    %26 = vector.load %arg1[%c0_16, %c0_17, %c0_18, %c1_19] : memref<1x4x18x18xf32, #tpu.memory_space<vmem>>, vector<1x1x16x16xf32>
    %27 = vector.shape_cast %26 : vector<1x1x16x16xf32> to vector<16x16xf32>
    %28 = vector.broadcast %25 : f32 to vector<16x16xf32>
    %29 = arith.mulf %27, %28 : vector<16x16xf32>
    %30 = arith.addf %24, %29 : vector<16x16xf32>
    %c5 = arith.constant 5 : index
    %31 = memref.load %arg2[%c5] : memref<36xf32, #tpu.memory_space<smem>>
    %c0_20 = arith.constant 0 : index
    %c1_21 = arith.constant 1 : index
    %c0_22 = arith.constant 0 : index
    %c1_23 = arith.constant 1 : index
    %32 = vector.load %arg1[%c0_20, %c1_21, %c0_22, %c1_23] : memref<1x4x18x18xf32, #tpu.memory_space<vmem>>, vector<1x1x16x16xf32>
    %33 = vector.shape_cast %32 : vector<1x1x16x16xf32> to vector<16x16xf32>
    %34 = vector.broadcast %31 : f32 to vector<16x16xf32>
    %35 = arith.mulf %33, %34 : vector<16x16xf32>
    %36 = arith.addf %30, %35 : vector<16x16xf32>
    %c6 = arith.constant 6 : index
    %37 = memref.load %arg2[%c6] : memref<36xf32, #tpu.memory_space<smem>>
    %c0_24 = arith.constant 0 : index
    %c2_25 = arith.constant 2 : index
    %c0_26 = arith.constant 0 : index
    %c1_27 = arith.constant 1 : index
    %38 = vector.load %arg1[%c0_24, %c2_25, %c0_26, %c1_27] : memref<1x4x18x18xf32, #tpu.memory_space<vmem>>, vector<1x1x16x16xf32>
    %39 = vector.shape_cast %38 : vector<1x1x16x16xf32> to vector<16x16xf32>
    %40 = vector.broadcast %37 : f32 to vector<16x16xf32>
    %41 = arith.mulf %39, %40 : vector<16x16xf32>
    %42 = arith.addf %36, %41 : vector<16x16xf32>
    %c7 = arith.constant 7 : index
    %43 = memref.load %arg2[%c7] : memref<36xf32, #tpu.memory_space<smem>>
    %c0_28 = arith.constant 0 : index
    %c3_29 = arith.constant 3 : index
    %c0_30 = arith.constant 0 : index
    %c1_31 = arith.constant 1 : index
    %44 = vector.load %arg1[%c0_28, %c3_29, %c0_30, %c1_31] : memref<1x4x18x18xf32, #tpu.memory_space<vmem>>, vector<1x1x16x16xf32>
    %45 = vector.shape_cast %44 : vector<1x1x16x16xf32> to vector<16x16xf32>
    %46 = vector.broadcast %43 : f32 to vector<16x16xf32>
    %47 = arith.mulf %45, %46 : vector<16x16xf32>
    %48 = arith.addf %42, %47 : vector<16x16xf32>
    %c8 = arith.constant 8 : index
    %49 = memref.load %arg2[%c8] : memref<36xf32, #tpu.memory_space<smem>>
    %c0_32 = arith.constant 0 : index
    %c0_33 = arith.constant 0 : index
    %c0_34 = arith.constant 0 : index
    %c2_35 = arith.constant 2 : index
    %50 = vector.load %arg1[%c0_32, %c0_33, %c0_34, %c2_35] : memref<1x4x18x18xf32, #tpu.memory_space<vmem>>, vector<1x1x16x16xf32>
    %51 = vector.shape_cast %50 : vector<1x1x16x16xf32> to vector<16x16xf32>
    %52 = vector.broadcast %49 : f32 to vector<16x16xf32>
    %53 = arith.mulf %51, %52 : vector<16x16xf32>
    %54 = arith.addf %48, %53 : vector<16x16xf32>
    %c9 = arith.constant 9 : index
    %55 = memref.load %arg2[%c9] : memref<36xf32, #tpu.memory_space<smem>>
    %c0_36 = arith.constant 0 : index
    %c1_37 = arith.constant 1 : index
    %c0_38 = arith.constant 0 : index
    %c2_39 = arith.constant 2 : index
    %56 = vector.load %arg1[%c0_36, %c1_37, %c0_38, %c2_39] : memref<1x4x18x18xf32, #tpu.memory_space<vmem>>, vector<1x1x16x16xf32>
    %57 = vector.shape_cast %56 : vector<1x1x16x16xf32> to vector<16x16xf32>
    %58 = vector.broadcast %55 : f32 to vector<16x16xf32>
    %59 = arith.mulf %57, %58 : vector<16x16xf32>
    %60 = arith.addf %54, %59 : vector<16x16xf32>
    %c10 = arith.constant 10 : index
    %61 = memref.load %arg2[%c10] : memref<36xf32, #tpu.memory_space<smem>>
    %c0_40 = arith.constant 0 : index
    %c2_41 = arith.constant 2 : index
    %c0_42 = arith.constant 0 : index
    %c2_43 = arith.constant 2 : index
    %62 = vector.load %arg1[%c0_40, %c2_41, %c0_42, %c2_43] : memref<1x4x18x18xf32, #tpu.memory_space<vmem>>, vector<1x1x16x16xf32>
    %63 = vector.shape_cast %62 : vector<1x1x16x16xf32> to vector<16x16xf32>
    %64 = vector.broadcast %61 : f32 to vector<16x16xf32>
    %65 = arith.mulf %63, %64 : vector<16x16xf32>
    %66 = arith.addf %60, %65 : vector<16x16xf32>
    %c11 = arith.constant 11 : index
    %67 = memref.load %arg2[%c11] : memref<36xf32, #tpu.memory_space<smem>>
    %c0_44 = arith.constant 0 : index
    %c3_45 = arith.constant 3 : index
    %c0_46 = arith.constant 0 : index
    %c2_47 = arith.constant 2 : index
    %68 = vector.load %arg1[%c0_44, %c3_45, %c0_46, %c2_47] : memref<1x4x18x18xf32, #tpu.memory_space<vmem>>, vector<1x1x16x16xf32>
    %69 = vector.shape_cast %68 : vector<1x1x16x16xf32> to vector<16x16xf32>
    %70 = vector.broadcast %67 : f32 to vector<16x16xf32>
    %71 = arith.mulf %69, %70 : vector<16x16xf32>
    %72 = arith.addf %66, %71 : vector<16x16xf32>
    %c12 = arith.constant 12 : index
    %73 = memref.load %arg2[%c12] : memref<36xf32, #tpu.memory_space<smem>>
    %c0_48 = arith.constant 0 : index
    %c0_49 = arith.constant 0 : index
    %c1_50 = arith.constant 1 : index
    %c0_51 = arith.constant 0 : index
    %74 = vector.load %arg1[%c0_48, %c0_49, %c1_50, %c0_51] : memref<1x4x18x18xf32, #tpu.memory_space<vmem>>, vector<1x1x16x16xf32>
    %75 = vector.shape_cast %74 : vector<1x1x16x16xf32> to vector<16x16xf32>
    %76 = vector.broadcast %73 : f32 to vector<16x16xf32>
    %77 = arith.mulf %75, %76 : vector<16x16xf32>
    %78 = arith.addf %72, %77 : vector<16x16xf32>
    %c13 = arith.constant 13 : index
    %79 = memref.load %arg2[%c13] : memref<36xf32, #tpu.memory_space<smem>>
    %c0_52 = arith.constant 0 : index
    %c1_53 = arith.constant 1 : index
    %c1_54 = arith.constant 1 : index
    %c0_55 = arith.constant 0 : index
    %80 = vector.load %arg1[%c0_52, %c1_53, %c1_54, %c0_55] : memref<1x4x18x18xf32, #tpu.memory_space<vmem>>, vector<1x1x16x16xf32>
    %81 = vector.shape_cast %80 : vector<1x1x16x16xf32> to vector<16x16xf32>
    %82 = vector.broadcast %79 : f32 to vector<16x16xf32>
    %83 = arith.mulf %81, %82 : vector<16x16xf32>
    %84 = arith.addf %78, %83 : vector<16x16xf32>
    %c14 = arith.constant 14 : index
    %85 = memref.load %arg2[%c14] : memref<36xf32, #tpu.memory_space<smem>>
    %c0_56 = arith.constant 0 : index
    %c2_57 = arith.constant 2 : index
    %c1_58 = arith.constant 1 : index
    %c0_59 = arith.constant 0 : index
    %86 = vector.load %arg1[%c0_56, %c2_57, %c1_58, %c0_59] : memref<1x4x18x18xf32, #tpu.memory_space<vmem>>, vector<1x1x16x16xf32>
    %87 = vector.shape_cast %86 : vector<1x1x16x16xf32> to vector<16x16xf32>
    %88 = vector.broadcast %85 : f32 to vector<16x16xf32>
    %89 = arith.mulf %87, %88 : vector<16x16xf32>
    %90 = arith.addf %84, %89 : vector<16x16xf32>
    %c15 = arith.constant 15 : index
    %91 = memref.load %arg2[%c15] : memref<36xf32, #tpu.memory_space<smem>>
    %c0_60 = arith.constant 0 : index
    %c3_61 = arith.constant 3 : index
    %c1_62 = arith.constant 1 : index
    %c0_63 = arith.constant 0 : index
    %92 = vector.load %arg1[%c0_60, %c3_61, %c1_62, %c0_63] : memref<1x4x18x18xf32, #tpu.memory_space<vmem>>, vector<1x1x16x16xf32>
    %93 = vector.shape_cast %92 : vector<1x1x16x16xf32> to vector<16x16xf32>
    %94 = vector.broadcast %91 : f32 to vector<16x16xf32>
    %95 = arith.mulf %93, %94 : vector<16x16xf32>
    %96 = arith.addf %90, %95 : vector<16x16xf32>
    %c16 = arith.constant 16 : index
    %97 = memref.load %arg2[%c16] : memref<36xf32, #tpu.memory_space<smem>>
    %c0_64 = arith.constant 0 : index
    %c0_65 = arith.constant 0 : index
    %c1_66 = arith.constant 1 : index
    %c1_67 = arith.constant 1 : index
    %98 = vector.load %arg1[%c0_64, %c0_65, %c1_66, %c1_67] : memref<1x4x18x18xf32, #tpu.memory_space<vmem>>, vector<1x1x16x16xf32>
    %99 = vector.shape_cast %98 : vector<1x1x16x16xf32> to vector<16x16xf32>
    %100 = vector.broadcast %97 : f32 to vector<16x16xf32>
    %101 = arith.mulf %99, %100 : vector<16x16xf32>
    %102 = arith.addf %96, %101 : vector<16x16xf32>
    %c17 = arith.constant 17 : index
    %103 = memref.load %arg2[%c17] : memref<36xf32, #tpu.memory_space<smem>>
    %c0_68 = arith.constant 0 : index
    %c1_69 = arith.constant 1 : index
    %c1_70 = arith.constant 1 : index
    %c1_71 = arith.constant 1 : index
    %104 = vector.load %arg1[%c0_68, %c1_69, %c1_70, %c1_71] : memref<1x4x18x18xf32, #tpu.memory_space<vmem>>, vector<1x1x16x16xf32>
    %105 = vector.shape_cast %104 : vector<1x1x16x16xf32> to vector<16x16xf32>
    %106 = vector.broadcast %103 : f32 to vector<16x16xf32>
    %107 = arith.mulf %105, %106 : vector<16x16xf32>
    %108 = arith.addf %102, %107 : vector<16x16xf32>
    %c18 = arith.constant 18 : index
    %109 = memref.load %arg2[%c18] : memref<36xf32, #tpu.memory_space<smem>>
    %c0_72 = arith.constant 0 : index
    %c2_73 = arith.constant 2 : index
    %c1_74 = arith.constant 1 : index
    %c1_75 = arith.constant 1 : index
    %110 = vector.load %arg1[%c0_72, %c2_73, %c1_74, %c1_75] : memref<1x4x18x18xf32, #tpu.memory_space<vmem>>, vector<1x1x16x16xf32>
    %111 = vector.shape_cast %110 : vector<1x1x16x16xf32> to vector<16x16xf32>
    %112 = vector.broadcast %109 : f32 to vector<16x16xf32>
    %113 = arith.mulf %111, %112 : vector<16x16xf32>
    %114 = arith.addf %108, %113 : vector<16x16xf32>
    %c19 = arith.constant 19 : index
    %115 = memref.load %arg2[%c19] : memref<36xf32, #tpu.memory_space<smem>>
    %c0_76 = arith.constant 0 : index
    %c3_77 = arith.constant 3 : index
    %c1_78 = arith.constant 1 : index
    %c1_79 = arith.constant 1 : index
    %116 = vector.load %arg1[%c0_76, %c3_77, %c1_78, %c1_79] : memref<1x4x18x18xf32, #tpu.memory_space<vmem>>, vector<1x1x16x16xf32>
    %117 = vector.shape_cast %116 : vector<1x1x16x16xf32> to vector<16x16xf32>
    %118 = vector.broadcast %115 : f32 to vector<16x16xf32>
    %119 = arith.mulf %117, %118 : vector<16x16xf32>
    %120 = arith.addf %114, %119 : vector<16x16xf32>
    %c20 = arith.constant 20 : index
    %121 = memref.load %arg2[%c20] : memref<36xf32, #tpu.memory_space<smem>>
    %c0_80 = arith.constant 0 : index
    %c0_81 = arith.constant 0 : index
    %c1_82 = arith.constant 1 : index
    %c2_83 = arith.constant 2 : index
    %122 = vector.load %arg1[%c0_80, %c0_81, %c1_82, %c2_83] : memref<1x4x18x18xf32, #tpu.memory_space<vmem>>, vector<1x1x16x16xf32>
    %123 = vector.shape_cast %122 : vector<1x1x16x16xf32> to vector<16x16xf32>
    %124 = vector.broadcast %121 : f32 to vector<16x16xf32>
    %125 = arith.mulf %123, %124 : vector<16x16xf32>
    %126 = arith.addf %120, %125 : vector<16x16xf32>
    %c21 = arith.constant 21 : index
    %127 = memref.load %arg2[%c21] : memref<36xf32, #tpu.memory_space<smem>>
    %c0_84 = arith.constant 0 : index
    %c1_85 = arith.constant 1 : index
    %c1_86 = arith.constant 1 : index
    %c2_87 = arith.constant 2 : index
    %128 = vector.load %arg1[%c0_84, %c1_85, %c1_86, %c2_87] : memref<1x4x18x18xf32, #tpu.memory_space<vmem>>, vector<1x1x16x16xf32>
    %129 = vector.shape_cast %128 : vector<1x1x16x16xf32> to vector<16x16xf32>
    %130 = vector.broadcast %127 : f32 to vector<16x16xf32>
    %131 = arith.mulf %129, %130 : vector<16x16xf32>
    %132 = arith.addf %126, %131 : vector<16x16xf32>
    %c22 = arith.constant 22 : index
    %133 = memref.load %arg2[%c22] : memref<36xf32, #tpu.memory_space<smem>>
    %c0_88 = arith.constant 0 : index
    %c2_89 = arith.constant 2 : index
    %c1_90 = arith.constant 1 : index
    %c2_91 = arith.constant 2 : index
    %134 = vector.load %arg1[%c0_88, %c2_89, %c1_90, %c2_91] : memref<1x4x18x18xf32, #tpu.memory_space<vmem>>, vector<1x1x16x16xf32>
    %135 = vector.shape_cast %134 : vector<1x1x16x16xf32> to vector<16x16xf32>
    %136 = vector.broadcast %133 : f32 to vector<16x16xf32>
    %137 = arith.mulf %135, %136 : vector<16x16xf32>
    %138 = arith.addf %132, %137 : vector<16x16xf32>
    %c23 = arith.constant 23 : index
    %139 = memref.load %arg2[%c23] : memref<36xf32, #tpu.memory_space<smem>>
    %c0_92 = arith.constant 0 : index
    %c3_93 = arith.constant 3 : index
    %c1_94 = arith.constant 1 : index
    %c2_95 = arith.constant 2 : index
    %140 = vector.load %arg1[%c0_92, %c3_93, %c1_94, %c2_95] : memref<1x4x18x18xf32, #tpu.memory_space<vmem>>, vector<1x1x16x16xf32>
    %141 = vector.shape_cast %140 : vector<1x1x16x16xf32> to vector<16x16xf32>
    %142 = vector.broadcast %139 : f32 to vector<16x16xf32>
    %143 = arith.mulf %141, %142 : vector<16x16xf32>
    %144 = arith.addf %138, %143 : vector<16x16xf32>
    %c24 = arith.constant 24 : index
    %145 = memref.load %arg2[%c24] : memref<36xf32, #tpu.memory_space<smem>>
    %c0_96 = arith.constant 0 : index
    %c0_97 = arith.constant 0 : index
    %c2_98 = arith.constant 2 : index
    %c0_99 = arith.constant 0 : index
    %146 = vector.load %arg1[%c0_96, %c0_97, %c2_98, %c0_99] : memref<1x4x18x18xf32, #tpu.memory_space<vmem>>, vector<1x1x16x16xf32>
    %147 = vector.shape_cast %146 : vector<1x1x16x16xf32> to vector<16x16xf32>
    %148 = vector.broadcast %145 : f32 to vector<16x16xf32>
    %149 = arith.mulf %147, %148 : vector<16x16xf32>
    %150 = arith.addf %144, %149 : vector<16x16xf32>
    %c25 = arith.constant 25 : index
    %151 = memref.load %arg2[%c25] : memref<36xf32, #tpu.memory_space<smem>>
    %c0_100 = arith.constant 0 : index
    %c1_101 = arith.constant 1 : index
    %c2_102 = arith.constant 2 : index
    %c0_103 = arith.constant 0 : index
    %152 = vector.load %arg1[%c0_100, %c1_101, %c2_102, %c0_103] : memref<1x4x18x18xf32, #tpu.memory_space<vmem>>, vector<1x1x16x16xf32>
    %153 = vector.shape_cast %152 : vector<1x1x16x16xf32> to vector<16x16xf32>
    %154 = vector.broadcast %151 : f32 to vector<16x16xf32>
    %155 = arith.mulf %153, %154 : vector<16x16xf32>
    %156 = arith.addf %150, %155 : vector<16x16xf32>
    %c26 = arith.constant 26 : index
    %157 = memref.load %arg2[%c26] : memref<36xf32, #tpu.memory_space<smem>>
    %c0_104 = arith.constant 0 : index
    %c2_105 = arith.constant 2 : index
    %c2_106 = arith.constant 2 : index
    %c0_107 = arith.constant 0 : index
    %158 = vector.load %arg1[%c0_104, %c2_105, %c2_106, %c0_107] : memref<1x4x18x18xf32, #tpu.memory_space<vmem>>, vector<1x1x16x16xf32>
    %159 = vector.shape_cast %158 : vector<1x1x16x16xf32> to vector<16x16xf32>
    %160 = vector.broadcast %157 : f32 to vector<16x16xf32>
    %161 = arith.mulf %159, %160 : vector<16x16xf32>
    %162 = arith.addf %156, %161 : vector<16x16xf32>
    %c27 = arith.constant 27 : index
    %163 = memref.load %arg2[%c27] : memref<36xf32, #tpu.memory_space<smem>>
    %c0_108 = arith.constant 0 : index
    %c3_109 = arith.constant 3 : index
    %c2_110 = arith.constant 2 : index
    %c0_111 = arith.constant 0 : index
    %164 = vector.load %arg1[%c0_108, %c3_109, %c2_110, %c0_111] : memref<1x4x18x18xf32, #tpu.memory_space<vmem>>, vector<1x1x16x16xf32>
    %165 = vector.shape_cast %164 : vector<1x1x16x16xf32> to vector<16x16xf32>
    %166 = vector.broadcast %163 : f32 to vector<16x16xf32>
    %167 = arith.mulf %165, %166 : vector<16x16xf32>
    %168 = arith.addf %162, %167 : vector<16x16xf32>
    %c28 = arith.constant 28 : index
    %169 = memref.load %arg2[%c28] : memref<36xf32, #tpu.memory_space<smem>>
    %c0_112 = arith.constant 0 : index
    %c0_113 = arith.constant 0 : index
    %c2_114 = arith.constant 2 : index
    %c1_115 = arith.constant 1 : index
    %170 = vector.load %arg1[%c0_112, %c0_113, %c2_114, %c1_115] : memref<1x4x18x18xf32, #tpu.memory_space<vmem>>, vector<1x1x16x16xf32>
    %171 = vector.shape_cast %170 : vector<1x1x16x16xf32> to vector<16x16xf32>
    %172 = vector.broadcast %169 : f32 to vector<16x16xf32>
    %173 = arith.mulf %171, %172 : vector<16x16xf32>
    %174 = arith.addf %168, %173 : vector<16x16xf32>
    %c29 = arith.constant 29 : index
    %175 = memref.load %arg2[%c29] : memref<36xf32, #tpu.memory_space<smem>>
    %c0_116 = arith.constant 0 : index
    %c1_117 = arith.constant 1 : index
    %c2_118 = arith.constant 2 : index
    %c1_119 = arith.constant 1 : index
    %176 = vector.load %arg1[%c0_116, %c1_117, %c2_118, %c1_119] : memref<1x4x18x18xf32, #tpu.memory_space<vmem>>, vector<1x1x16x16xf32>
    %177 = vector.shape_cast %176 : vector<1x1x16x16xf32> to vector<16x16xf32>
    %178 = vector.broadcast %175 : f32 to vector<16x16xf32>
    %179 = arith.mulf %177, %178 : vector<16x16xf32>
    %180 = arith.addf %174, %179 : vector<16x16xf32>
    %c30 = arith.constant 30 : index
    %181 = memref.load %arg2[%c30] : memref<36xf32, #tpu.memory_space<smem>>
    %c0_120 = arith.constant 0 : index
    %c2_121 = arith.constant 2 : index
    %c2_122 = arith.constant 2 : index
    %c1_123 = arith.constant 1 : index
    %182 = vector.load %arg1[%c0_120, %c2_121, %c2_122, %c1_123] : memref<1x4x18x18xf32, #tpu.memory_space<vmem>>, vector<1x1x16x16xf32>
    %183 = vector.shape_cast %182 : vector<1x1x16x16xf32> to vector<16x16xf32>
    %184 = vector.broadcast %181 : f32 to vector<16x16xf32>
    %185 = arith.mulf %183, %184 : vector<16x16xf32>
    %186 = arith.addf %180, %185 : vector<16x16xf32>
    %c31 = arith.constant 31 : index
    %187 = memref.load %arg2[%c31] : memref<36xf32, #tpu.memory_space<smem>>
    %c0_124 = arith.constant 0 : index
    %c3_125 = arith.constant 3 : index
    %c2_126 = arith.constant 2 : index
    %c1_127 = arith.constant 1 : index
    %188 = vector.load %arg1[%c0_124, %c3_125, %c2_126, %c1_127] : memref<1x4x18x18xf32, #tpu.memory_space<vmem>>, vector<1x1x16x16xf32>
    %189 = vector.shape_cast %188 : vector<1x1x16x16xf32> to vector<16x16xf32>
    %190 = vector.broadcast %187 : f32 to vector<16x16xf32>
    %191 = arith.mulf %189, %190 : vector<16x16xf32>
    %192 = arith.addf %186, %191 : vector<16x16xf32>
    %c32 = arith.constant 32 : index
    %193 = memref.load %arg2[%c32] : memref<36xf32, #tpu.memory_space<smem>>
    %c0_128 = arith.constant 0 : index
    %c0_129 = arith.constant 0 : index
    %c2_130 = arith.constant 2 : index
    %c2_131 = arith.constant 2 : index
    %194 = vector.load %arg1[%c0_128, %c0_129, %c2_130, %c2_131] : memref<1x4x18x18xf32, #tpu.memory_space<vmem>>, vector<1x1x16x16xf32>
    %195 = vector.shape_cast %194 : vector<1x1x16x16xf32> to vector<16x16xf32>
    %196 = vector.broadcast %193 : f32 to vector<16x16xf32>
    %197 = arith.mulf %195, %196 : vector<16x16xf32>
    %198 = arith.addf %192, %197 : vector<16x16xf32>
    %c33 = arith.constant 33 : index
    %199 = memref.load %arg2[%c33] : memref<36xf32, #tpu.memory_space<smem>>
    %c0_132 = arith.constant 0 : index
    %c1_133 = arith.constant 1 : index
    %c2_134 = arith.constant 2 : index
    %c2_135 = arith.constant 2 : index
    %200 = vector.load %arg1[%c0_132, %c1_133, %c2_134, %c2_135] : memref<1x4x18x18xf32, #tpu.memory_space<vmem>>, vector<1x1x16x16xf32>
    %201 = vector.shape_cast %200 : vector<1x1x16x16xf32> to vector<16x16xf32>
    %202 = vector.broadcast %199 : f32 to vector<16x16xf32>
    %203 = arith.mulf %201, %202 : vector<16x16xf32>
    %204 = arith.addf %198, %203 : vector<16x16xf32>
    %c34 = arith.constant 34 : index
    %205 = memref.load %arg2[%c34] : memref<36xf32, #tpu.memory_space<smem>>
    %c0_136 = arith.constant 0 : index
    %c2_137 = arith.constant 2 : index
    %c2_138 = arith.constant 2 : index
    %c2_139 = arith.constant 2 : index
    %206 = vector.load %arg1[%c0_136, %c2_137, %c2_138, %c2_139] : memref<1x4x18x18xf32, #tpu.memory_space<vmem>>, vector<1x1x16x16xf32>
    %207 = vector.shape_cast %206 : vector<1x1x16x16xf32> to vector<16x16xf32>
    %208 = vector.broadcast %205 : f32 to vector<16x16xf32>
    %209 = arith.mulf %207, %208 : vector<16x16xf32>
    %210 = arith.addf %204, %209 : vector<16x16xf32>
    %c35 = arith.constant 35 : index
    %211 = memref.load %arg2[%c35] : memref<36xf32, #tpu.memory_space<smem>>
    %c0_140 = arith.constant 0 : index
    %c3_141 = arith.constant 3 : index
    %c2_142 = arith.constant 2 : index
    %c2_143 = arith.constant 2 : index
    %212 = vector.load %arg1[%c0_140, %c3_141, %c2_142, %c2_143] : memref<1x4x18x18xf32, #tpu.memory_space<vmem>>, vector<1x1x16x16xf32>
    %213 = vector.shape_cast %212 : vector<1x1x16x16xf32> to vector<16x16xf32>
    %214 = vector.broadcast %211 : f32 to vector<16x16xf32>
    %215 = arith.mulf %213, %214 : vector<16x16xf32>
    %216 = arith.addf %210, %215 : vector<16x16xf32>
    %c0_144 = arith.constant 0 : index
    %217 = memref.load %arg3[%c0_144] : memref<1xf32, #tpu.memory_space<smem>>
    %218 = vector.broadcast %217 : f32 to vector<16x16xf32>
    %219 = arith.addf %216, %218 : vector<16x16xf32>
    %c0_145 = arith.constant 0 : index
    %c0_146 = arith.constant 0 : index
    %c0_147 = arith.constant 0 : index
    %220 = vector.load %arg4[%c0_145, %c0_146, %c0_147] : memref<1x16x16xf32, #tpu.memory_space<vmem>>, vector<1x16x16xf32>
    %221 = vector.shape_cast %220 : vector<1x16x16xf32> to vector<16x16xf32>
    %222 = vector.shape_cast %219 : vector<16x16xf32> to vector<1x16x16xf32>
    tpu.vector_store %arg4[%c0_145, %c0_146, %c0_147], %222 {strides = array<i32>} : memref<1x16x16xf32, #tpu.memory_space<vmem>>, vector<1x16x16xf32>,
    return
  }
  func.func @transform_0(%arg0: i32) -> (i32, i32, i32, i32) {
    %c0_i32 = arith.constant 0 : i32
    %c0_i32_0 = arith.constant 0 : i32
    %c0_i32_1 = arith.constant 0 : i32
    %c0_i32_2 = arith.constant 0 : i32
    return %arg0, %c0_i32, %c0_i32_0, %c0_i32_1 : i32, i32, i32, i32
  }
  func.func @transform_1(%arg0: i32) -> i32 {
    %c0_i32 = arith.constant 0 : i32
    %c0_i32_0 = arith.constant 0 : i32
    return %c0_i32 : i32
  }
  func.func @transform_2(%arg0: i32) -> i32 {
    %c0_i32 = arith.constant 0 : i32
    %c0_i32_0 = arith.constant 0 : i32
    return %c0_i32 : i32
  }
  func.func @transform_3(%arg0: i32) -> (i32, i32, i32) {
    %c0_i32 = arith.constant 0 : i32
    %c0_i32_0 = arith.constant 0 : i32
    %c0_i32_1 = arith.constant 0 : i32
    return %arg0, %c0_i32, %c0_i32_0 : i32, i32, i32
  }
}

</mosaic_0001>

<bundles_post_ra>
// kernel: tpu_custom_call.1
= control target key start
LH: loop header
LB: loop body
LE: loop exit
PB: predicated region body
PF: predicated region fallthrough
CT: control target
= control target key end

     0   :  { %s1256_s0 = inlined_call_operand.vmem [shape: f32[2,4,18,18], index: 0, kind: input, shape index: {}]   ;;  %s1257_s1 = inlined_call_operand.vmem [shape: f32[36], index: 1, kind: input, shape index: {}]   ;;  %s1258_s2 = inlined_call_operand.<no memory space> [shape: f32[1], index: 2, kind: input, shape index: {}]   ;;  %s1259_s3 = inlined_call_operand.hbm [shape: f32[2,16,16], index: 3, kind: output, shape index: {}]  }
   0x1   :  { %8 = sst [smem:[#allocation2]] %s1258_s2 }
   0x2   :  { %9 = vsyncpa [#allocation5], 0 }
   0x3   :  { %10 = vsyncpa [#allocation4], 0 }
   0x4   :  { %12 = vsyncpa [#allocation4 + $0x1], 0  ;;  %s948_s14 = smov 0   ;;  %s950_s15 = smov 0  }
   0x5   :  { %s952_s16 = smov 0   ;;  %s954_s17 = smov 0  }
   0x6 LB: > { %s969_s2 = sadd.s32 4294967295, %s917_s17   ;;  %s714_s18 = sadd.s32 4294967294, %s917_s17   ;;  %s917_s17 = sphi %s954_s17, %s1266_s17   ;;  %s913_s16 = sphi %s952_s16, %s1265_s16   ;;  %s909_s15 = sphi %s950_s15, %s1264_s15   ;;  %s905_s14 = sphi %s948_s14, %s1263_s14  }
   0x7   : > { %s973_s19 = sadd.s32 1, %s917_s17   ;;  %s93_s20 = sadd.s32 1, %s913_s16 }
   0x8   : > { %s90_s21 = ssub.s32 %s917_s17, %s973_s19  ;;  %p103_p0 = scmp.ne.s32.totalorder %s913_s16, %s909_s15 }
   0x9   : > { %p91_p1 = scmp.eq.s32.totalorder %s90_s21, 0  ;;  %p104_p2 = scmp.eq.s32.totalorder %s969_s2, 1 }
   0xa   : > { %p109_p3 = scmp.ne.s32.totalorder %s909_s15, %s905_s14  ;;  %p110_p4 = scmp.eq.s32.totalorder %s714_s18, 1 }
   0xb   : > { %s984_s22 = scalar_select %p91_p1, %s913_s16, %s93_s20  }
   0xc   : > { %p986_p5 = por %p104_p2, %p103_p0  ;;  %p990_p6 = por %p110_p4, %p109_p3 }
   0xd   : > { %p715_p7 = scmp.ge.s32.totalorder %s917_s17, 1  ;;  %p117_p8 = scmp.lt.s32.totalorder %s917_s17, 3 }
   0xe   : > { %p796_p9 = scmp.eq.s32.totalorder %s969_s2, 0  ;;  %s130_s28 = sshll.u32 %s1257_s1, 4  ;;  %s131_s28 = int_to_ptr.vmem [resolvable:$true] %s130_s28 }
   0xf   : > { %p997_p10 = pnand %p715_p7, %p117_p8  ;;  %s836_s29 = scalar_lea.vmem %s131_s28, 16 }
  0x10   : > { %p837_p13 = scmp.ne.s32.totalorder %s131_s28, %s836_s29  ;;  %p844_p3 = scmp.lt.s32.totalorder %s131_s28, %s131_s28 }
  0x11   : > { %p788_p11 = pneg %p997_p10  ;;  %p845_p4 = scmp.lt.s32.totalorder %s836_s29, %s836_s29 }
  0x13   : > { %p789_p12 = pnand %p796_p9, %p788_p11  ;;  %p846_p7 = por %p845_p4, %p844_p3 }
  0x15   : > { %p838_p0 = pneg %p789_p12 }
  0x17   : > { %p839_p1 = pnand %p838_p0, %p837_p13 }
  0x19   : > { %p840_p2 = pneg %p839_p1 }
  0x1b   : > { %p847_p8 = pnand %p846_p7, %p840_p2 }
  0x1d   : > { %850 = shalt.err (!%p847_p8)
}
  0x1e   : > { %s919_s30 = smov [#allocation3]   ;;  %154 = sbr.rel (%p997_p10) target bundleno = 278 (0x116), region = 32 }
  0x1f   : > { %791 = dma.vmem_to_smem (!%p789_p12), %s131_s28, 16, %s919_s30, [#allocation5]  }
  0x25   : > { %896 = dma.done.wait (%p796_p9), [#allocation5], 16  }
  0x26   : > { %898 = vsyncadd (%p796_p9), [#allocation5], 4294967280 }
  0x27   : > { %160 = sfence }
  0x28   : > { %p179_p11 = scmp.lt.s32.totalorder %s969_s2, 1  ;;  %s722_s4 = sld [smem:[#allocation3 + $0x1]]  ;;  %vm623_vm0 = vcmask 130048  }
  0x29   : > { %s732_s5 = sld [smem:[#allocation3 + $0x5]]  ;;  %s184_s7 = sld [smem:[#allocation3]] }
  0x2a   : > { %s180_s6 = scalar_select %p179_p11, %s969_s2, 1 }
  0x2b   : > { %s731_s8 = sld [smem:[#allocation3 + $0x4]]  ;;  %s1016_s10 = sld [smem:[#allocation3 + $0x6]] }
  0x2c   : > { %s781_s9 = smul.u32 96, %s180_s6  ;;  %s1026_s18 = sld [smem:[#allocation3 + $0x7]] }
  0x2d   : > { %s920_s20 = smov 127   ;;  %s735_s21 = sld [smem:[#allocation3 + $0x8]] }
  0x2e   : > { %s1021_s13 = scalar_lea.vmem %s1256_s0, %s781_s9  ;;  %v196_v0 = vstv %s722_s4  ;;  %s736_s25 = sld [smem:[#allocation3 + $0x9]] }
  0x2f   : > { %v723_v1 = vld [vmem:[%s1021_s13 + $0x18] sm:$0xff]  ;;  %v724_v2 = vld [vmem:[%s1021_s13 + $0x20] sm:$0xff]  ;;  %v234_v3 = vstv %s732_s5  ;;  %v186_v8 = vld [vmem:[%s1021_s13 + $0x8] sm:$0xff]  ;;  %s1040_s26 = sld [smem:[#allocation3 + $0xa]]  ;;  %s728_s28 = sld [smem:[#allocation3 + $0x3]] }
  0x30   : > { %v185_v4 = vld [vmem:[%s1021_s13] sm:$0xff]  ;;  %v235_v5 = vmul.f32 %v723_v1, %v234_v3  ;;  %v198_v6 = vmul.f32 %v724_v2, %v196_v0  ;;  %v197_v7 = vmul.f32 %v723_v1, %v196_v0  ;;  %v187_v9 = vstv %s184_s7  ;;  %v727_v15 = vld [vmem:[%s1021_s13 + $0x38] sm:$0xff]  ;;  %v726_v18 = vld [vmem:[%s1021_s13 + $0x30] sm:$0xff]  ;;  %s725_s27 = sld [smem:[#allocation3 + $0x2]]  ;;  %s1044_s29 = sld [smem:[#allocation3 + $0xb]] }
  0x31   : > { %v220_v10 = vstv %s731_s8  ;;  %v236_v11 = vmul.f32 %v724_v2, %v234_v3  ;;  %v189_v12 = vmul.f32 %v187_v9, %v186_v8  ;;  %v188_v14 = vmul.f32 %v187_v9, %v185_v4  ;;  %v730_v22 = vld [vmem:[%s1021_s13 + $0x50] sm:$0xff]  ;;  %v729_v25 = vld [vmem:[%s1021_s13 + $0x48] sm:$0xff]  ;;  %s921_s30 = smov 126   ;;  %s1049_s4 = sld [smem:[#allocation3 + $0x10]]  ;;  %v1076_v57 = vld [vmem:[%s1021_s13 + $0x19] sm:$0xff] }
  0x32   : > { %239 = vrot.lane.b32.xlu1 %v235_v5, %s920_s20  ;;  %v221_v13 = vmul.f32 %v220_v10, %v185_v4  ;;  %v248_v16 = vstv %s1016_s10  ;;  %v222_v17 = vmul.f32 %v220_v10, %v186_v8  ;;  %v262_v23 = vstv %s1026_s18  ;;  %s750_s5 = sld [smem:[#allocation3 + $0x11]]  ;;  %v1061_v49 = vld [vmem:[%s1021_s13 + $0x9] sm:$0xff]  ;;  %s751_s6 = sld [smem:[#allocation3 + $0x12]] }
  0x33   : > { %v199_v19 = vadd.f32 %v197_v7, %v188_v14  ;;  %v250_v20 = vmul.f32 %v727_v15, %v248_v16  ;;  %v200_v21 = vadd.f32 %v198_v6, %v189_v12  ;;  %v249_v24 = vmul.f32 %v726_v18, %v248_v16  ;;  %v1066_v52 = vld [vmem:[%s1021_s13 + $0x1] sm:$0xff]  ;;  %s752_s7 = sld [smem:[#allocation3 + $0x13]]  ;;  %v1081_v59 = vld [vmem:[%s1021_s13 + $0x39] sm:$0xff]  ;;  %s753_s8 = sld [smem:[#allocation3 + $0x14]]  ;;  %v1086_v62 = vld [vmem:[%s1021_s13 + $0x31] sm:$0xff] }
  0x34   : > { %225 = vrot.lane.b32.xlu0 %v221_v13, %s920_s20  ;;  %v264_v26 = vmul.f32 %v730_v22, %v262_v23  ;;  %v276_v27 = vstv %s735_s21  ;;  %v263_v28 = vmul.f32 %v729_v25, %v262_v23  ;;  %v290_v30 = vstv %s736_s25  ;;  %v1071_v54 = vld [vmem:[%s1021_s13 + $0x21] sm:$0xff]  ;;  %s754_s9 = sld [smem:[#allocation3 + $0x15]]  ;;  %s755_s10 = sld [smem:[#allocation3 + $0x16]] }
  0x35   : > { %v278_v29 = vmul.f32 %v276_v27, %v186_v8  ;;  %v277_v31 = vmul.f32 %v276_v27, %v185_v4  ;;  %v292_v32 = vmul.f32 %v724_v2, %v290_v30  ;;  %v304_v33 = vstv %s1040_s26  ;;  %v1091_v0 = vld [vmem:[%s1021_s13 + $0x51] sm:$0xff]  ;;  %v1096_v3 = vld [vmem:[%s1021_s13 + $0x49] sm:$0xff]  ;;  %s756_s11 = sld [smem:[#allocation3 + $0x17]]  ;;  %s767_s12 = sld [smem:[#allocation3 + $0x1c]]  ;;  %v1137_v27 = vld [vmem:[%s1021_s13 + $0x3a] sm:$0xff] }
  0x36   : > { %241 = vrot.lane.b32.xlu1 %v236_v11, %s920_s20  ;;  %v291_v34 = vmul.f32 %v723_v1, %v290_v30  ;;  %v205_v35 = vstv %s725_s27  ;;  %v214_v36 = vstv %s728_s28  ;;  %v306_v39 = vmul.f32 %v727_v15, %v304_v33  ;;  %s768_s18 = sld [smem:[#allocation3 + $0x1d]]  ;;  %s769_s21 = sld [smem:[#allocation3 + $0x1e]]  ;;  %v1142_v30 = vld [vmem:[%s1021_s13 + $0x32] sm:$0xff] }
  0x37   : > { %v206_v37 = vmul.f32 %v726_v18, %v205_v35  ;;  %v215_v38 = vmul.f32 %v729_v25, %v214_v36  ;;  %v207_v40 = vmul.f32 %v727_v15, %v205_v35  ;;  %v216_v41 = vmul.f32 %v730_v22, %v214_v36  ;;  %s770_s25 = sld [smem:[#allocation3 + $0x1f]]  ;;  %s771_s26 = sld [smem:[#allocation3 + $0x20]]  ;;  %v1152_v35 = vld [vmem:[%s1021_s13 + $0x4a] sm:$0xff] }
  0x38   : > { %227 = vrot.lane.b32.xlu0 %v222_v17, %s920_s20  ;;  %v318_v42 = vstv %s1044_s29  ;;  %v305_v44 = vmul.f32 %v726_v18, %v304_v33  ;;  %v364_v50 = vstv %s1049_s4  ;;  %v378_v55 = vstv %s750_s5  ;;  %s772_s27 = sld [smem:[#allocation3 + $0x21]]  ;;  %s773_s28 = sld [smem:[#allocation3 + $0x22]] }
  0x39   : > { %v208_v43 = vadd.f32 %v206_v37, %v199_v19  ;;  %v209_v45 = vadd.f32 %v207_v40, %v200_v21  ;;  %v320_v47 = vmul.f32 %v730_v22, %v318_v42  ;;  %v319_v51 = vmul.f32 %v729_v25, %v318_v42  ;;  %v1117_v17 = vld [vmem:[%s1021_s13 + $0xa] sm:$0xff]  ;;  %v1127_v22 = vld [vmem:[%s1021_s13 + $0x22] sm:$0xff]  ;;  %v1132_v25 = vld [vmem:[%s1021_s13 + $0x1a] sm:$0xff]  ;;  %s774_s29 = sld [smem:[#allocation3 + $0x23]]  ;;  %s1180_s4 = sld [smem:[#allocation3 + $0xf]] }
  0x3a   : > { %255 = vrot.lane.b32.xlu1 %v250_v20, %s920_s20  ;;  %v366_v53 = vmul.f32 %v364_v50, %v1061_v49  ;;  %v365_v56 = vmul.f32 %v364_v50, %v1066_v52  ;;  %v380_v58 = vmul.f32 %v1071_v54, %v378_v55  ;;  %v392_v60 = vstv %s751_s6  ;;  %v1122_v20 = vld [vmem:[%s1021_s13 + $0x2] sm:$0xff]  ;;  %s757_s5 = sld [smem:[#allocation3 + $0x18]]  ;;  %s758_s6 = sld [smem:[#allocation3 + $0x19]] }
  0x3b   : > { %v1055_v46 = vadd.f32 %v215_v38, %v208_v43  ;;  %v1058_v48 = vadd.f32 %v216_v41, %v209_v45  ;;  %v379_v61 = vmul.f32 %v1076_v57, %v378_v55  ;;  %v394_v63 = vmul.f32 %v1081_v59, %v392_v60 }
  0x3c   : > { %253 = vrot.lane.b32.xlu0 %v249_v24, %s920_s20  ;;  %v406_v1 = vstv %s752_s7  ;;  %v393_v2 = vmul.f32 %v1086_v62, %v392_v60  ;;  %v420_v5 = vstv %s753_s8  ;;  %v434_v8 = vstv %s754_s9  ;;  %s1192_s7 = sld [smem:[#allocation3 + $0x1a]]  ;;  %s1194_s8 = sld [smem:[#allocation3 + $0x1b]] }
  0x3d   : > { %v408_v4 = vmul.f32 %v1091_v0, %v406_v1  ;;  %v407_v6 = vmul.f32 %v1096_v3, %v406_v1  ;;  %v422_v7 = vmul.f32 %v420_v5, %v1061_v49  ;;  %v421_v9 = vmul.f32 %v420_v5, %v1066_v52  ;;  %s619_s9 = sld [smem:[#allocation2]] }
  0x3e   : > { %269 = vrot.lane.b32.xlu1 %v264_v26, %s920_s20  ;;  %v436_v10 = vmul.f32 %v1071_v54, %v434_v8  ;;  %v448_v11 = vstv %s755_s10  ;;  %v435_v12 = vmul.f32 %v1076_v57, %v434_v8  ;;  %v462_v14 = vstv %s756_s11  ;;  %s176_s10 = sand.u32 1, %s909_s15  }
  0x3f   : > { %v450_v13 = vmul.f32 %v1081_v59, %v448_v11  ;;  %v449_v15 = vmul.f32 %v1086_v62, %v448_v11  ;;  %v464_v16 = vmul.f32 %v1091_v0, %v462_v14  ;;  %v508_v18 = vstv %s767_s12  ;;  %s720_s11 = sshll.u32 %s176_s10, 4 }
  0x40   : > { %267 = vrot.lane.b32.xlu0 %v263_v28, %s920_s20  ;;  %v463_v19 = vmul.f32 %v1096_v3, %v462_v14  ;;  %v510_v21 = vmul.f32 %v508_v18, %v1117_v17  ;;  %v522_v23 = vstv %s768_s18  ;;  %v509_v24 = vmul.f32 %v508_v18, %v1122_v20  ;;  %s178_s12 = scalar_lea.vmem [#allocation6], %s720_s11 }
  0x41   : > { %v524_v26 = vmul.f32 %v1127_v22, %v522_v23  ;;  %v536_v28 = vstv %s769_s21  ;;  %v550_v33 = vstv %s770_s25  ;;  %v564_v37 = vstv %s771_s26  ;;  %s640_s18 = sshll.u32 %s178_s12, 4  ;;  %s780_s21 = sshll.u32 %s969_s2, 8  ;;  %s1213_s18 = int_to_ptr.vmem [resolvable:$true] %s640_s18 }
  0x42   : > { %283 = vrot.lane.b32.xlu1 %v278_v29, %s921_s30  ;;  %v523_v29 = vmul.f32 %v1132_v25, %v522_v23  ;;  %v551_v38 = vmul.f32 %v1152_v35, %v550_v33  ;;  %v578_v40 = vstv %s772_s27  ;;  %v565_v41 = vmul.f32 %v564_v37, %v1122_v20  ;;  %s1211_s27 = scalar_lea.hbm %s1259_s3, %s780_s21  ;;  %s851_s2 = scalar_lea.vmem %s1213_s18, 256 }
  0x43   : > { %v580_v42 = vmul.f32 %v1127_v22, %v578_v40  ;;  %v592_v43 = vstv %s773_s28  ;;  %s1215_s28 = scalar_lea.sflag [#allocation4], %s176_s10  ;;  %p852_p9 = scmp.ne.s32.totalorder %s1213_s18, %s851_s2 }
  0x44   : > { %281 = vrot.lane.b32.xlu0 %v277_v31, %s921_s30  ;;  %v538_v31 = vmul.f32 %v1137_v27, %v536_v28  ;;  %v594_v45 = vmul.f32 %v1137_v27, %v592_v43  ;;  %v593_v50 = vmul.f32 %v1142_v30, %v592_v43 }
  0x45   : > { %p853_p10 = pnand %p852_p9, %p986_p5 }
  0x46   : > { %297 = vrot.lane.b32.xlu1 %v292_v32, %s921_s30  ;;  %v1147_v32 = vld [vmem:[%s1021_s13 + $0x52] sm:$0xff]  ;;  %s739_s13 = sld [smem:[#allocation3 + $0xc]] }
  0x47   : > { %v552_v36 = vmul.f32 %v1147_v32, %v550_v33  ;;  %p854_p12 = pneg %p853_p10 }
  0x48   : > { %295 = vrot.lane.b32.xlu0 %v291_v34, %s921_s30  ;;  %v537_v34 = vmul.f32 %v1142_v30, %v536_v28 }
  0x4a   : > { %311 = vrot.lane.b32.xlu1 %v306_v39, %s921_s30  ;;  %v566_v39 = vmul.f32 %v564_v37, %v1117_v17 }
  0x4c   : > { %309 = vrot.lane.b32.xlu0 %v305_v44, %s921_s30  ;;  %v579_v44 = vmul.f32 %v1132_v25, %v578_v40 }
  0x4e   : > { %325 = vrot.lane.b32.xlu1 %v320_v47, %s921_s30  ;;  %v606_v47 = vstv %s774_s29  ;;  %s922_s29 = smov [#allocation6]  }
  0x50   : > { %323 = vrot.lane.b32.xlu0 %v319_v51, %s921_s30  ;;  %v608_v51 = vmul.f32 %v1147_v32, %v606_v47 }
  0x52   : > { %371 = vrot.lane.b32.xlu1 %v366_v53, %s920_s20  ;;  %v607_v53 = vmul.f32 %v1152_v35, %v606_v47 }
  0x54   : > { %369 = vrot.lane.b32.xlu0 %v365_v56, %s920_s20 }
  0x56   : > { %385 = vrot.lane.b32.xlu1 %v380_v58, %s920_s20 }
  0x58   : > { %383 = vrot.lane.b32.xlu0 %v379_v61, %s920_s20 }
  0x5a   : > { %399 = vrot.lane.b32.xlu1 %v394_v63, %s920_s20 }
  0x5c   : > { %397 = vrot.lane.b32.xlu0 %v393_v2, %s920_s20 }
  0x5e   : > { %413 = vrot.lane.b32.xlu1 %v408_v4, %s920_s20 }
  0x60   : > { %411 = vrot.lane.b32.xlu0 %v407_v6, %s920_s20 }
  0x62   : > { %427 = vrot.lane.b32.xlu1 %v422_v7, %s921_s30 }
  0x64   : > { %425 = vrot.lane.b32.xlu0 %v421_v9, %s921_s30 }
  0x66   : > { %441 = vrot.lane.b32.xlu1 %v436_v10, %s921_s30 }
  0x68   : > { %439 = vrot.lane.b32.xlu0 %v435_v12, %s921_s30 }
  0x6a   : > { %455 = vrot.lane.b32.xlu1 %v450_v13, %s921_s30 }
  0x6c   : > { %453 = vrot.lane.b32.xlu0 %v449_v15, %s921_s30 }
  0x6e   : > { %469 = vrot.lane.b32.xlu1 %v464_v16, %s921_s30 }
  0x70   : > { %467 = vrot.lane.b32.xlu0 %v463_v19, %s921_s30 }
  0x72   : > { %515 = vrot.lane.b32.xlu1 %v510_v21, %s920_s20 }
  0x74   : > { %513 = vrot.lane.b32.xlu0 %v509_v24, %s920_s20 }
  0x76   : > { %529 = vrot.lane.b32.xlu1 %v524_v26, %s920_s20 }
  0x78   : > { %527 = vrot.lane.b32.xlu0 %v523_v29, %s920_s20 }
  0x7a   : > { %543 = vrot.lane.b32.xlu1 %v538_v31, %s920_s20 }
  0x7c   : > { %541 = vrot.lane.b32.xlu0 %v537_v34, %s920_s20 }
  0x7e   : > { %557 = vrot.lane.b32.xlu1 %v552_v36, %s920_s20 }
  0x80   : > { %555 = vrot.lane.b32.xlu0 %v551_v38, %s920_s20  ;;  %s740_s20 = sld [smem:[#allocation3 + $0xd]] }
  0x82   : > { %571 = vrot.lane.b32.xlu1 %v566_v39, %s921_s30  ;;  %v358_v39 = vstv %s1180_s4 }
  0x84   : > { %569 = vrot.lane.b32.xlu0 %v565_v41, %s921_s30 }
  0x86   : > { %585 = vrot.lane.b32.xlu1 %v580_v42, %s921_s30  ;;  %v342_v23 = vstv %s740_s20 }
  0x87   : > { %v344_v34 = vmul.f32 %v1071_v54, %v342_v23  ;;  %v343_v41 = vmul.f32 %v1076_v57, %v342_v23 }
  0x88   : > { %583 = vrot.lane.b32.xlu0 %v579_v44, %s921_s30 }
  0x8a   : > { %599 = vrot.lane.b32.xlu1 %v594_v45, %s921_s30 }
  0x8c   : > { %597 = vrot.lane.b32.xlu0 %v593_v50, %s921_s30 }
  0x8e   : > { %613 = vrot.lane.b32.xlu1 %v608_v51, %s921_s30 }
  0x90   : > { %611 = vrot.lane.b32.xlu0 %v607_v53, %s921_s30  ;;  %s1178_s30 = sld [smem:[#allocation3 + $0xe]] }
  0x96   : > { %v350_v31 = vstv %s1178_s30 }
  0x97   : > { %v352_v43 = vmul.f32 %v1081_v59, %v350_v31  ;;  %v351_v50 = vmul.f32 %v1086_v62, %v350_v31 }
  0xa4   : > { %v240_v55 = vpop.permute.xlu1 %239 }
  0xa6   : > { %v226_v56 = vpop.permute.xlu0 %225 }
  0xa7   : > { %v231_v5 = vadd.f32 %v226_v56, %v1055_v46  ;;  %v334_v46 = vstv %s739_s13  ;;  %s855_s13 = sshll.u32 %s922_s29, 4  ;;  %s856_s13 = int_to_ptr.vmem [resolvable:$false] %s855_s13 }
  0xa8   : > { %v242_v58 = vpop.permute.xlu1 %241  ;;  %v336_v28 = vmul.f32 %v334_v46, %v1061_v49  ;;  %v335_v37 = vmul.f32 %v334_v46, %v1066_v52  ;;  %v360_v49 = vmul.f32 %v1091_v0, %v358_v39  ;;  %v359_v52 = vmul.f32 %v1096_v3, %v358_v39  ;;  %s857_s20 = scalar_lea.vmem %s856_s13, 512  ;;  %p858_p13 = scmp.lt.s32.totalorder %s1213_s18, %s856_s13 }
  0xa9   : > { %v245_v10 = vadd.f32 %v240_v55, %v231_v5  ;;  %v486_v46 = vstv %s758_s6  ;;  %p859_p0 = scmp.lt.s32.totalorder %s857_s20, %s851_s2 }
  0xaa   : > { %v228_v60 = vpop.permute.xlu0 %227 }
  0xab   : > { %v232_v1 = vadd.f32 %v228_v60, %v1058_v48  ;;  %p860_p1 = por %p859_p0, %p858_p13 }
  0xac   : > { %v256_v61 = vpop.permute.xlu1 %255 }
  0xad   : > { %v246_v6 = vadd.f32 %v242_v58, %v232_v1  ;;  %p861_p2 = pnand %p860_p1, %p854_p12 }
  0xae   : > { %v254_v63 = vpop.permute.xlu0 %253 }
  0xaf   : > { %v260_v9 = vadd.f32 %v256_v61, %v246_v6  ;;  %v259_v12 = vadd.f32 %v254_v63, %v245_v10 }
  0xb0   : > { %v270_v2 = vpop.permute.xlu1 %269 }
  0xb1   : > { %v274_v13 = vadd.f32 %v270_v2, %v260_v9 }
  0xb2   : > { %v268_v4 = vpop.permute.xlu0 %267 }
  0xb3   : > { %v273_v48 = vadd.f32 %v268_v4, %v259_v12 }
  0xb4   : > { %v284_v7 = vpop.permute.xlu1 %283 }
  0xb5   : > { %v288_v15 = vadd.f32 %v284_v7, %v274_v13 }
  0xb6   : > { %v282_v8 = vpop.permute.xlu0 %281 }
  0xb7   : > { %v287_v18 = vadd.f32 %v282_v8, %v273_v48 }
  0xb8   : > { %v298_v11 = vpop.permute.xlu1 %297 }
  0xb9   : > { %v302_v19 = vadd.f32 %v298_v11, %v288_v15 }
  0xba   : > { %v296_v14 = vpop.permute.xlu0 %295 }
  0xbb   : > { %v301_v24 = vadd.f32 %v296_v14, %v287_v18  ;;  %v478_v14 = vstv %s757_s5 }
  0xbc   : > { %v312_v16 = vpop.permute.xlu1 %311  ;;  %v479_v31 = vmul.f32 %v478_v14, %v1122_v20 }
  0xbd   : > { %v316_v26 = vadd.f32 %v312_v16, %v302_v19 }
  0xbe   : > { %v310_v21 = vpop.permute.xlu0 %309 }
  0xbf   : > { %v315_v33 = vadd.f32 %v310_v21, %v301_v24  ;;  %v480_v21 = vmul.f32 %v478_v14, %v1117_v17  ;;  %v494_v24 = vstv %s1192_s7 }
  0xc0   : > { %v326_v29 = vpop.permute.xlu1 %325  ;;  %v496_v39 = vmul.f32 %v1137_v27, %v494_v24 }
  0xc1   : > { %v330_v36 = vadd.f32 %v326_v29, %v316_v26 }
  0xc2   : > { %v324_v38 = vpop.permute.xlu0 %323 }
  0xc3   : > { %v338_v40 = vadd.f32 %v336_v28, %v330_v36  ;;  %v329_v42 = vadd.f32 %v324_v38, %v315_v33  ;;  %v488_v28 = vmul.f32 %v1127_v22, %v486_v46 }
  0xc4   : > { %v372_v44 = vpop.permute.xlu1 %371 }
  0xc5   : > { %v346_v45 = vadd.f32 %v344_v34, %v338_v40  ;;  %v337_v47 = vadd.f32 %v335_v37, %v329_v42  ;;  %v502_v34 = vstv %s1194_s8  ;;  %v487_v37 = vmul.f32 %v1132_v25, %v486_v46 }
  0xc6   : > { %v370_v51 = vpop.permute.xlu0 %369  ;;  %v504_v17 = vmul.f32 %v1147_v32, %v502_v34  ;;  %v503_v20 = vmul.f32 %v1152_v35, %v502_v34 }
  0xc7   : > { %v345_v54 = vadd.f32 %v343_v41, %v337_v47  ;;  %v354_v53 = vadd.f32 %v352_v43, %v346_v45  ;;  %v495_v43 = vmul.f32 %v1142_v30, %v494_v24 }
  0xc8   : > { %v386_v55 = vpop.permute.xlu1 %385 }
  0xc9   : > { %v362_v56 = vadd.f32 %v360_v49, %v354_v53  ;;  %v353_v58 = vadd.f32 %v351_v50, %v345_v54 }
  0xca   : > { %v384_v60 = vpop.permute.xlu0 %383 }
  0xcb   : > { %v361_v57 = vadd.f32 %v359_v52, %v353_v58  ;;  %v376_v63 = vadd.f32 %v372_v44, %v362_v56 }
  0xcc   : > { %v400_v61 = vpop.permute.xlu1 %399 }
  0xcd   : > { %v375_v1 = vadd.f32 %v370_v51, %v361_v57  ;;  %v390_v4 = vadd.f32 %v386_v55, %v376_v63 }
  0xce   : > { %v398_v59 = vpop.permute.xlu0 %397 }
  0xcf   : > { %v389_v0 = vadd.f32 %v384_v60, %v375_v1  ;;  %v404_v62 = vadd.f32 %v400_v61, %v390_v4 }
  0xd0   : > { %v414_v2 = vpop.permute.xlu1 %413 }
  0xd1   : > { %v403_v8 = vadd.f32 %v398_v59, %v389_v0  ;;  %v418_v9 = vadd.f32 %v414_v2, %v404_v62 }
  0xd2   : > { %v412_v5 = vpop.permute.xlu0 %411 }
  0xd3   : > { %v417_v11 = vadd.f32 %v412_v5, %v403_v8  ;;  %v620_v8 = vstv %s619_s9 }
  0xd4   : > { %v428_v6 = vpop.permute.xlu1 %427 }
  0xd5   : > { %v432_v12 = vadd.f32 %v428_v6, %v418_v9 }
  0xd6   : > { %v426_v7 = vpop.permute.xlu0 %425 }
  0xd7   : > { %v431_v48 = vadd.f32 %v426_v7, %v417_v11 }
  0xd8   : > { %v442_v3 = vpop.permute.xlu1 %441 }
  0xd9   : > { %v446_v15 = vadd.f32 %v442_v3, %v432_v12 }
  0xda   : > { %v440_v10 = vpop.permute.xlu0 %439 }
  0xdb   : > { %v445_v18 = vadd.f32 %v440_v10, %v431_v48 }
  0xdc   : > { %v456_v13 = vpop.permute.xlu1 %455 }
  0xdd   : > { %v460_v19 = vadd.f32 %v456_v13, %v446_v15 }
  0xde   : > { %v454_v16 = vpop.permute.xlu0 %453 }
  0xdf   : > { %v459_v26 = vadd.f32 %v454_v16, %v445_v18 }
  0xe0   : > { %v470_v23 = vpop.permute.xlu1 %469 }
  0xe1   : > { %v474_v29 = vadd.f32 %v470_v23, %v460_v19 }
  0xe2   : > { %v468_v33 = vpop.permute.xlu0 %467 }
  0xe3   : > { %v482_v36 = vadd.f32 %v480_v21, %v474_v29  ;;  %v473_v38 = vadd.f32 %v468_v33, %v459_v26 }
  0xe4   : > { %v516_v40 = vpop.permute.xlu1 %515 }
  0xe5   : > { %v490_v41 = vadd.f32 %v488_v28, %v482_v36  ;;  %v481_v42 = vadd.f32 %v479_v31, %v473_v38 }
  0xe6   : > { %v514_v44 = vpop.permute.xlu0 %513 }
  0xe7   : > { %v489_v22 = vadd.f32 %v487_v37, %v481_v42  ;;  %v498_v45 = vadd.f32 %v496_v39, %v490_v41 }
  0xe8   : > { %v530_v47 = vpop.permute.xlu1 %529 }
  0xe9   : > { %v506_v49 = vadd.f32 %v504_v17, %v498_v45  ;;  %v497_v50 = vadd.f32 %v495_v43, %v489_v22 }
  0xea   : > { %v528_v51 = vpop.permute.xlu0 %527 }
  0xeb   : > { %v505_v25 = vadd.f32 %v503_v20, %v497_v50  ;;  %v520_v27 = vadd.f32 %v516_v40, %v506_v49 }
  0xec   : > { %v544_v54 = vpop.permute.xlu1 %543 }
  0xed   : > { %v519_v52 = vadd.f32 %v514_v44, %v505_v25  ;;  %v534_v56 = vadd.f32 %v530_v47, %v520_v27 }
  0xee   : > { %v542_v53 = vpop.permute.xlu0 %541 }
  0xef   : > { %v533_v58 = vadd.f32 %v528_v51, %v519_v52  ;;  %v548_v60 = vadd.f32 %v544_v54, %v534_v56 }
  0xf0   : > { %v558_v55 = vpop.permute.xlu1 %557 }
  0xf1   : > { %v547_v61 = vadd.f32 %v542_v53, %v533_v58  ;;  %v562_v35 = vadd.f32 %v558_v55, %v548_v60 }
  0xf2   : > { %v556_v32 = vpop.permute.xlu0 %555 }
  0xf3   : > { %v561_v1 = vadd.f32 %v556_v32, %v547_v61 }
  0xf4   : > { %v572_v30 = vpop.permute.xlu1 %571 }
  0xf5   : > { %v576_v2 = vadd.f32 %v572_v30, %v562_v35 }
  0xf6   : > { %v570_v57 = vpop.permute.xlu0 %569 }
  0xf7   : > { %v575_v5 = vadd.f32 %v570_v57, %v561_v1 }
  0xf8   : > { %v586_v63 = vpop.permute.xlu1 %585 }
  0xf9   : > { %v590_v0 = vadd.f32 %v586_v63, %v576_v2 }
  0xfa   : > { %v584_v59 = vpop.permute.xlu0 %583 }
  0xfb   : > { %v589_v62 = vadd.f32 %v584_v59, %v575_v5 }
  0xfc   : > { %v600_v4 = vpop.permute.xlu1 %599 }
  0xfd   : > { %v604_v7 = vadd.f32 %v600_v4, %v590_v0 }
  0xfe   : > { %v598_v6 = vpop.permute.xlu0 %597 }
  0xff   : > { %v603_v9 = vadd.f32 %v598_v6, %v589_v62 }
 0x100   : > { %v614_v3 = vpop.permute.xlu1 %613 }
 0x101   : > { %v618_v10 = vadd.f32 %v614_v3, %v604_v7 }
 0x102   : > { %v612_v11 = vpop.permute.xlu0 %611 }
 0x103   : > { %v622_v12 = vadd.f32 %v620_v8, %v618_v10  ;;  %v617_v13 = vadd.f32 %v612_v11, %v603_v9 }
 0x105   : > { %625 = vst.msk [vmem:[%s178_s12 + $0x8] sm:$0xff] %vm623_vm0, %v622_v12  ;;  %v621_v14 = vadd.f32 %v620_v8, %v617_v13 }
 0x107   : > { %624 = vst.msk [vmem:[%s178_s12] sm:$0xff] %vm623_vm0, %v621_v14 }
 0x108   : > { %864 = shalt.err (!%p861_p2)
}
 0x109   : > { %s865_s30 = scalar_lea.hbm %s1211_s27, 256  ;;  %s869_s6 = scalar_lea.hbm %s1259_s3, 512 }
 0x10a   : > { %p866_p3 = scmp.ne.s32.totalorder %s1211_s27, %s865_s30  ;;  %p870_p8 = scmp.lt.u32.totalorder %s1211_s27, %s1259_s3 }
 0x10b   : > { %p871_p11 = scmp.lt.u32.totalorder %s869_s6, %s865_s30  ;;  %p873_p10 = scmp.lt.u32.totalorder %s865_s30, %s1211_s27 }
 0x10c   : > { %p867_p4 = pnand %p866_p3, %p986_p5 }
 0x10d   : > { %p872_p9 = por %p871_p11, %p870_p8 }
 0x10e   : > { %p868_p7 = pneg %p867_p4 }
 0x10f   : > { %p874_p12 = por %p873_p10, %p872_p9 }
 0x111   : > { %p875_p13 = pnand %p874_p12, %p868_p7 }
 0x113   : > { %878 = shalt.err (!%p875_p13)
}
 0x114   : > { %s923_s9 = smov 128   ;;  %s924_s10 = smov 8  }
 0x115   : > { %786 = dma.vmem_to_hbm [thread:$0]  (%p986_p5), %s1213_s18, 256, %s1211_s27, %s1215_s28, %s923_s9, %s923_s9, %s924_s10  }
 0x116 PF: > { %p798_p0 = scmp.ge.s32.totalorder %s917_s17, 2  ;;  %s655_s11 = sand.u32 1, %s905_s14  }
 0x117   : > { %s656_s12 = scalar_lea.sflag [#allocation4], %s655_s11 }
 0x118   : > { %p793_p1 = pnand %p798_p0, %p990_p6 }
 0x11a   : > { %900 = dma.done.wait (!%p793_p1), %s656_s12, 256  }
 0x11b   : > { %902 = vsyncadd (!%p793_p1), %s656_s12, 4294967040  ;;  %p15_p2 = scmp.ge.s32.totalorder %s973_s19, 4   ;;  %s1263_s14 = smov %s909_s15 }
 0x11c   : > { %s1264_s15 = smov %s913_s16  ;;  %s1265_s16 = smov %s984_s22 }
 0x11d   : > { %s1266_s17 = smov %s973_s19  ;;  %17 = sbr.rel (!%p15_p2) target bundleno = 6 (0x6), region = 75 }
 0x124   :  { %661 = vsyncpa [#allocation4], 1 }
 0x125   :  { %663 = vsyncpa [#allocation4 + $0x1], 1 }
 0x126   :  { %664 = vsyncpa [#allocation5], 1 }
 0x127   :  { %666 = vsyncpa [#allocation5 + $0x1], 1 }

</bundles_post_ra>
